<compile_context>
chip_gen: v5e
topology: v5e:2x2
jax: 0.10.0
libtpu: 0.0.40
codegen_flags: <defaults>
</compile_context>

<pallas_src>
import math

import jax
import jax.numpy as jnp
from jax.experimental import pallas as pl
from jax.experimental.pallas import tpu as pltpu


# ---------------------------------------------------------------------------
# Kernels
# ---------------------------------------------------------------------------
def _single_shot_kernel(has_bias):
    """One matmul per grid step: no K reduction, no accumulator scratch."""
    def kernel(*refs):
        if has_bias:
            src_ref, w_ref, b_ref, out_ref = refs
        else:
            src_ref, w_ref, out_ref = refs
            b_ref = None
        a = src_ref[...]
        w = w_ref[...]
        if a.dtype != w.dtype:          # bf16 MXU fast path: cast activations
            a = a.astype(w.dtype)
        r = jnp.dot(a, w, preferred_element_type=jnp.float32)
        if has_bias:
            r = r + b_ref[...].astype(jnp.float32)
        out_ref[...] = r.astype(out_ref.dtype)
    return kernel


def _k_tiled_kernel(has_bias, use_scratch):
    """K-reduction kernel.  f32 outputs accumulate directly into out_ref
    (resident across the K axis); other dtypes use an f32 scratch.  The
    accumulator is initialized with the first partial product (bias folded in),
    never with a zeros pass."""
    def kernel(*refs):
        if use_scratch:
            if has_bias:
                src_ref, w_ref, b_ref, out_ref, acc_ref = refs
            else:
                src_ref, w_ref, out_ref, acc_ref = refs
                b_ref = None
        else:
            if has_bias:
                src_ref, w_ref, b_ref, out_ref = refs
            else:
                src_ref, w_ref, out_ref = refs
                b_ref = None
            acc_ref = out_ref           # f32 output: accumulate in place

        k = pl.program_id(1)
        a = src_ref[...]
        w = w_ref[...]
        if a.dtype != w.dtype:
            a = a.astype(w.dtype)
        p = jnp.dot(a, w, preferred_element_type=jnp.float32)

        @pl.when(k == 0)
        def _init():
            if has_bias:
                acc_ref[...] = p + b_ref[...].astype(jnp.float32)
            else:
                acc_ref[...] = p

        @pl.when(k > 0)
        def _accumulate():
            acc_ref[...] += p

        if use_scratch:
            @pl.when(k == pl.num_programs(1) - 1)
            def _finalize():
                out_ref[...] = acc_ref[...].astype(out_ref.dtype)
    return kernel


# ---------------------------------------------------------------------------
# Helpers
# ---------------------------------------------------------------------------
def _round_up(x, m):
    return ((x + m - 1) // m) * m


def _block_diagonal(weight):
    """[groups, in_g, out_g] -> block-diagonal [groups*in_g, groups*out_g]."""
    groups, in_g, out_g = weight.shape
    if groups == 1:
        return weight[0]
    eye = jnp.eye(groups, dtype=weight.dtype)
    wbd = jnp.einsum("gio,gh->giho", weight, eye)      # exact (x*0, x*1)
    return wbd.reshape(groups * in_g, groups * out_g)


def _vmem_budgets():
    """(tile budget bytes, vmem_limit_bytes, two_tensorcores?) per generation."""
    vmem_cap = None
    try:
        info = pltpu.get_tpu_info()
        cap = int(getattr(info, "vmem_capacity_bytes", 0) or 0)
        vmem_cap = cap if cap > 0 else None
    except Exception:
        vmem_cap = None
    if vmem_cap is None:
        vmem_cap = 64 * 1024 * 1024                    # conservative (v7x per-TC)
    if vmem_cap >= 100 * 1024 * 1024:                  # v5e / v6e: 128 MiB, 1 TC
        return 48 * 1024 * 1024, 96 * 1024 * 1024, False
    return 22 * 1024 * 1024, 48 * 1024 * 1024, True    # v7x: 64 MiB per TC, 2 TCs


def _choose_tk(in_ch, out_ch_pad, w_itemsize, budget_bytes):
    """Largest 128-multiple divisor of in_ch whose double-buffered weight tile
    fits the budget headroom (only called when the full weight does not fit)."""
    cands = [c for c in (8192, 4096, 2048, 1024, 512, 256, 128) if in_ch % c == 0]
    for c in cands:
        if 2 * c * out_ch_pad * w_itemsize <= budget_bytes // 2:
            return c
    return cands[-1] if cands else in_ch


def _choose_tn(n_rows, per_row_bytes, resident_bytes, budget_bytes,
               sublane, two_tc, cap=2048):
    """Row tile sized to the VMEM budget; on 2-TC chips keep grid_n >= 2."""
    avail = budget_bytes - resident_bytes
    if avail < per_row_bytes * sublane:
        avail = per_row_bytes * sublane
    tn = min(cap, n_rows, avail // per_row_bytes)
    if two_tc and n_rows >= 2 * sublane:
        half = -(-n_rows // 2)
        half = max(sublane, (half // sublane) * sublane)
        tn = min(tn, half)
    if tn >= n_rows:
        return n_rows
    if tn >= 512:
        tn = (tn // 256) * 256                         # match 256x256 MXU on v6e/v7x
    else:
        tn = max(sublane, (tn // sublane) * sublane)
    return int(tn)


# ---------------------------------------------------------------------------
# Wrapper (forward pass of AttLinear)
# ---------------------------------------------------------------------------
def att_linear(src, weight, bias=None, *, compute_dtype=None, _budget_override=None):
    """Pallas implementation of AttLinear.forward.

    src:    [..., in_channels]
    weight: [groups, in_channels // groups, out_channels // groups]
    bias:   [out_channels] or None
    compute_dtype: optional MXU input dtype (e.g. jnp.bfloat16); acc stays f32.
    """
    groups, in_g, out_g = weight.shape
    in_channels = groups * in_g
    out_channels = groups * out_g
    assert src.shape[-1] == in_channels

    lead = src.shape[:-1]
    n_rows = int(math.prod(lead)) if lead else 1
    src2d = src.reshape(n_rows, in_channels)           # free: no transpose
    out_dtype = src2d.dtype
    has_bias = bias is not None

    budget, vmem_limit, two_tc = _vmem_budgets()
    if _budget_override is not None:
        budget = int(_budget_override)

    w_dtype = compute_dtype if compute_dtype is not None else src2d.dtype
    w_itemsize = jnp.dtype(w_dtype).itemsize
    src_itemsize = jnp.dtype(src2d.dtype).itemsize
    out_itemsize = jnp.dtype(out_dtype).itemsize
    sublane = {4: 8, 2: 16, 1: 32}.get(src_itemsize, 8)

    # ------------------------------------------------------------------
    # Per-group grid path: avoids groups-x weight/VMEM/MXU inflation of the
    # block-diagonal formulation when per-group widths stay lane-dense.
    # ------------------------------------------------------------------
    use_per_group = (groups >= 4 and in_g % 128 == 0 and out_g % 128 == 0
                     and in_g * out_g * w_itemsize <= budget // 3)
    if use_per_group:
        w_g = weight.astype(w_dtype)
        per_row = 2 * in_g * src_itemsize + 2 * out_g * out_itemsize
        resident = 2 * in_g * out_g * w_itemsize + (2 * out_g * 4 if has_bias else 0)
        tn = _choose_tn(n_rows, per_row, resident, budget, sublane, two_tc)
        grid_n = pl.cdiv(n_rows, tn)

        in_specs = [
            pl.BlockSpec((tn, in_g), lambda g, n: (n, g)),
            pl.BlockSpec((None, in_g, out_g), lambda g, n: (g, 0, 0)),  # resident per group
        ]
        operands = [src2d, w_g]
        if has_bias:
            in_specs.append(pl.BlockSpec((1, out_g), lambda g, n: (0, g)))
            operands.append(bias.reshape(1, out_channels))
        out_spec = pl.BlockSpec((tn, out_g), lambda g, n: (n, g))

        flops = 2 * n_rows * in_channels * out_g       # true per-group FLOPs
        bytes_accessed = (
            n_rows * in_channels * src_itemsize
            + groups * in_g * out_g * w_itemsize
            + n_rows * out_channels * out_itemsize
            + (out_channels * jnp.dtype(bias.dtype).itemsize if has_bias else 0))

        out2d = pl.pallas_call(
            _single_shot_kernel(has_bias),
            out_shape=jax.ShapeDtypeStruct((n_rows, out_channels), out_dtype),
            grid=(groups, grid_n),
            in_specs=in_specs,
            out_specs=out_spec,
            compiler_params=pltpu.CompilerParams(
                dimension_semantics=("parallel", "parallel"),
                vmem_limit_bytes=vmem_limit),
            cost_estimate=pl.CostEstimate(
                flops=int(flops), transcendentals=0,
                bytes_accessed=int(bytes_accessed)),
        )(*operands)
        return out2d.reshape(lead + (out_channels,))

    # ------------------------------------------------------------------
    # Block-diagonal path (small per-group widths, or groups == 1).
    # ------------------------------------------------------------------
    w_bd = _block_diagonal(weight).astype(w_dtype)

    # Lane-dense output: zero-pad weight/bias columns to a multiple of 128.
    out_ch_pad = _round_up(out_channels, 128)
    if out_ch_pad != out_channels:
        w_bd = jnp.pad(w_bd, ((0, 0), (0, out_ch_pad - out_channels)))
    b2d = None
    if has_bias:
        b2d = bias.reshape(1, out_channels)
        if out_ch_pad != out_channels:
            b2d = jnp.pad(b2d, ((0, 0), (0, out_ch_pad - out_channels)))

    in_ch_eff = in_channels
    weight_fits = in_ch_eff * out_ch_pad * w_itemsize <= budget // 3
    if not weight_fits and in_channels % 128 != 0:
        # K-tiling required but K not 128-aligned: zero-pad the contraction dim
        # (rare; zeros contribute nothing to the matmul).
        in_ch_eff = _round_up(in_channels, 128)
        src2d = jnp.pad(src2d, ((0, 0), (0, in_ch_eff - in_channels)))
        w_bd = jnp.pad(w_bd, ((0, in_ch_eff - in_channels), (0, 0)))

    tk = in_ch_eff if weight_fits else _choose_tk(in_ch_eff, out_ch_pad, w_itemsize, budget)
    grid_k = in_ch_eff // tk

    use_scratch = (grid_k > 1) and (out_dtype != jnp.float32)
    per_row = (2 * tk * src_itemsize + 2 * out_ch_pad * out_itemsize
               + (out_ch_pad * 4 if use_scratch else 0))
    resident = 2 * tk * out_ch_pad * w_itemsize + (2 * out_ch_pad * 4 if has_bias else 0)
    tn = _choose_tn(n_rows, per_row, resident, budget, sublane, two_tc)
    grid_n = pl.cdiv(n_rows, tn)

    operands = [src2d, w_bd]
    if grid_k == 1:
        grid = (grid_n,)
        in_specs = [
            pl.BlockSpec((tn, in_ch_eff), lambda n: (n, 0)),
            pl.BlockSpec((in_ch_eff, out_ch_pad), lambda n: (0, 0)),   # weight resident
        ]
        if has_bias:
            in_specs.append(pl.BlockSpec((1, out_ch_pad), lambda n: (0, 0)))
            operands.append(b2d)
        out_spec = pl.BlockSpec((tn, out_ch_pad), lambda n: (n, 0))
        kernel = _single_shot_kernel(has_bias)
        scratch_shapes = []
        dim_sem = ("parallel",)
        weight_reads = 1
    else:
        grid = (grid_n, grid_k)
        in_specs = [
            pl.BlockSpec((tn, tk), lambda n, k: (n, k)),
            pl.BlockSpec((tk, out_ch_pad), lambda n, k: (k, 0)),
        ]
        if has_bias:
            in_specs.append(pl.BlockSpec((1, out_ch_pad), lambda n, k: (0, 0)))
            operands.append(b2d)
        out_spec = pl.BlockSpec((tn, out_ch_pad), lambda n, k: (n, 0))
        kernel = _k_tiled_kernel(has_bias, use_scratch)
        scratch_shapes = ([pltpu.VMEM((tn, out_ch_pad), jnp.float32)]
                          if use_scratch else [])
        dim_sem = ("parallel", "arbitrary")
        weight_reads = grid_n                           # weight re-streamed per N tile

    flops = 2 * n_rows * in_channels * out_g            # true per-group FLOPs
    bytes_accessed = (
        n_rows * in_ch_eff * src_itemsize
        + weight_reads * in_ch_eff * out_ch_pad * w_itemsize
        + n_rows * out_ch_pad * out_itemsize
        + (out_ch_pad * jnp.dtype(bias.dtype).itemsize if has_bias else 0))

    out2d = pl.pallas_call(
        kernel,
        out_shape=jax.ShapeDtypeStruct((n_rows, out_ch_pad), out_dtype),
        grid=grid,
        in_specs=in_specs,
        out_specs=out_spec,
        scratch_shapes=scratch_shapes,
        compiler_params=pltpu.CompilerParams(
            dimension_semantics=dim_sem,
            vmem_limit_bytes=vmem_limit),
        cost_estimate=pl.CostEstimate(
            flops=int(flops), transcendentals=0,
            bytes_accessed=int(bytes_accessed)),
    )(*operands)

    if out_ch_pad != out_channels:
        out2d = out2d[:, :out_channels]
    return out2d.reshape(lead + (out_channels,))


# ---------------------------------------------------------------------------
# Parameter init matching reset_parameters
# ---------------------------------------------------------------------------
def init_att_linear_params(key, in_channels, out_channels, groups=1, bias=True):
    """kaiming_uniform(weight, fan=in_g, a=sqrt(5)) and uniform(in_g, bias):
       both reduce to bound = 1/sqrt(in_g)."""
    in_g = in_channels // groups
    out_g = out_channels // groups
    kw, kb = jax.random.split(key)
    bound = 1.0 / math.sqrt(in_g)
    weight = jax.random.uniform(
        kw, (groups, in_g, out_g), dtype=jnp.float32, minval=-bound, maxval=bound)
    b = (jax.random.uniform(
            kb, (out_channels,), dtype=jnp.float32, minval=-bound, maxval=bound)
         if bias else None)
    return weight, b


if __name__ == "__main__":
    key = jax.random.PRNGKey(0)
    k_src, k_par, k_src2, k_par2 = jax.random.split(key, 4)

    def reference(src, weight, bias):
        g, in_g, out_g = weight.shape
        lead = src.shape[:-1]
        s = src.reshape(-1, g, in_g).transpose(1, 0, 2).astype(jnp.float32)
        o = jnp.matmul(s, weight.astype(jnp.float32)).transpose(1, 0, 2)
        o = o.reshape(lead + (g * out_g,))
        if bias is not None:
            o = o + bias.astype(jnp.float32)
        return o

    batch, seq = 2, 8

    # --- Test 1: small block-diagonal path (out_channels padded to 128) ---
    in_channels, out_channels, groups = 32, 32, 4
    src = jax.random.normal(k_src, (batch, seq, in_channels), dtype=jnp.float32)
    weight, bias = init_att_linear_params(k_par, in_channels, out_channels, groups)
    out = jax.block_until_ready(att_linear(src, weight, bias))
    ref = reference(src, weight, bias)
    assert out.shape == (batch, seq, out_channels)
    assert jnp.allclose(out, ref, atol=1e-5, rtol=1e-5)

    # no-bias specialization
    out_nb = jax.block_until_ready(att_linear(src, weight, None))
    assert jnp.allclose(out_nb, reference(src, weight, None), atol=1e-5, rtol=1e-5)

    # bf16 MXU fast path (f32 accumulation) — loose tolerance
    out_bf = jax.block_until_ready(
        att_linear(src, weight, bias, compute_dtype=jnp.bfloat16))
    assert float(jnp.max(jnp.abs(out_bf - ref))) < 0.1

    # --- Test 2: per-group grid path (groups>=4, 128-aligned per-group dims) ---
    in_channels2, out_channels2, groups2 = 512, 512, 4
    src2 = jax.random.normal(k_src2, (batch, seq, in_channels2), dtype=jnp.float32)
    weight2, bias2 = init_att_linear_params(k_par2, in_channels2, out_channels2, groups2)
    out2 = jax.block_until_ready(att_linear(src2, weight2, bias2))
    ref2 = reference(src2, weight2, bias2)
    assert out2.shape == (batch, seq, out_channels2)
    assert jnp.allclose(out2, ref2, atol=1e-4, rtol=1e-4)

    # --- Test 3: K-tiled path, f32 output accumulated in-place (tiny budget) ---
    in_channels3, out_channels3, groups3 = 256, 128, 1
    src3 = jax.random.normal(k_src, (batch, seq, in_channels3), dtype=jnp.float32)
    weight3, bias3 = init_att_linear_params(k_par, in_channels3, out_channels3, groups3)
    out3 = jax.block_until_ready(
        att_linear(src3, weight3, bias3, _budget_override=64 * 1024))
    ref3 = reference(src3, weight3, bias3)
    assert jnp.allclose(out3, ref3, atol=1e-4, rtol=1e-4)

    # --- Test 4: K-tiled path with bf16 output (f32 scratch accumulator) ---
    src4 = src3.astype(jnp.bfloat16)
    out4 = jax.block_until_ready(
        att_linear(src4, weight3, bias3, _budget_override=64 * 1024))
    ref4 = reference(src4.astype(jnp.float32), weight3, bias3)
    assert out4.dtype == jnp.bfloat16
    assert float(jnp.max(jnp.abs(out4.astype(jnp.float32) - ref4))) < 0.15

    print("KERNEL_OK")
</pallas_src>

<mosaic_0001>
module attributes {stable_mosaic.version = 11 : i64} {
  func.func @kernel(%arg0: i32, %arg1: memref<8x32xf32, #tpu.memory_space<vmem>>, %arg2: memref<32x128xf32, #tpu.memory_space<vmem>>, %arg3: memref<1x128xf32, #tpu.memory_space<vmem>>, %arg4: memref<8x128xf32, #tpu.memory_space<vmem>>) attributes {dimension_semantics = [#tpu.dimension_semantics<parallel>], iteration_bounds = array<i64: 2>, scalar_prefetch = 0 : i64, scratch_operands = 0 : i64, tpu.core_type = #tpu.core_type<tc>, window_params = [{transform_indices = @transform_0, window_bounds = array<i64: 8, 32>}, {pipeline_mode = #tpu.pipeline_mode<synchronous>, transform_indices = @transform_1, window_bounds = array<i64: 32, 128>}, {pipeline_mode = #tpu.pipeline_mode<synchronous>, transform_indices = @transform_2, window_bounds = array<i64: 1, 128>}, {transform_indices = @transform_3, window_bounds = array<i64: 8, 128>}]} {
    %c0 = arith.constant 0 : index
    %c0_0 = arith.constant 0 : index
    %0 = vector.load %arg1[%c0, %c0_0] : memref<8x32xf32, #tpu.memory_space<vmem>>, vector<8x32xf32>
    %c0_1 = arith.constant 0 : index
    %c0_2 = arith.constant 0 : index
    %1 = vector.load %arg2[%c0_1, %c0_2] : memref<32x128xf32, #tpu.memory_space<vmem>>, vector<32x128xf32>
    %cst = arith.constant dense<0.000000e+00> : vector<8x128xf32>
    %2 = tpu.matmul %0, %1, %cst {dimension_numbers = #tpu.dot_dimension_numbers<[1], [0], [0], [1], [0, 0, 1, 1], [], []>} : vector<8x32xf32>, vector<32x128xf32>, vector<8x128xf32> -> vector<8x128xf32>
    %c0_3 = arith.constant 0 : index
    %c0_4 = arith.constant 0 : index
    %3 = vector.load %arg3[%c0_3, %c0_4] : memref<1x128xf32, #tpu.memory_space<vmem>>, vector<1x128xf32>
    %4 = vector.broadcast %3 : vector<1x128xf32> to vector<8x128xf32>
    %5 = arith.addf %2, %4 : vector<8x128xf32>
    %c0_5 = arith.constant 0 : index
    %c0_6 = arith.constant 0 : index
    %6 = vector.load %arg4[%c0_5, %c0_6] : memref<8x128xf32, #tpu.memory_space<vmem>>, vector<8x128xf32>
    tpu.vector_store %arg4[%c0_5, %c0_6], %5 {strides = array<i32>} : memref<8x128xf32, #tpu.memory_space<vmem>>, vector<8x128xf32>,
    return
  }
  func.func @transform_0(%arg0: i32) -> (i32, i32) {
    %c0_i32 = arith.constant 0 : i32
    %c0_i32_0 = arith.constant 0 : i32
    return %arg0, %c0_i32 : i32, i32
  }
  func.func @transform_1(%arg0: i32) -> (i32, i32) {
    %c0_i32 = arith.constant 0 : i32
    %c0_i32_0 = arith.constant 0 : i32
    %c0_i32_1 = arith.constant 0 : i32
    return %c0_i32, %c0_i32_0 : i32, i32
  }
  func.func @transform_2(%arg0: i32) -> (i32, i32) {
    %c0_i32 = arith.constant 0 : i32
    %c0_i32_0 = arith.constant 0 : i32
    %c0_i32_1 = arith.constant 0 : i32
    return %c0_i32, %c0_i32_0 : i32, i32
  }
  func.func @transform_3(%arg0: i32) -> (i32, i32) {
    %c0_i32 = arith.constant 0 : i32
    %c0_i32_0 = arith.constant 0 : i32
    return %arg0, %c0_i32 : i32, i32
  }
}

</mosaic_0001>

<bundles_post_ra>
// kernel: tpu_custom_call.1
= control target key start
LH: loop header
LB: loop body
LE: loop exit
PB: predicated region body
PF: predicated region fallthrough
CT: control target
= control target key end

     0   :  { %8 = vsyncpa [#allocation3], 0  ;;  %s704_s0 = inlined_call_operand.hbm [shape: f32[16,32], index: 0, kind: input, shape index: {}]   ;;  %s705_s1 = inlined_call_operand.hbm [shape: f32[32,128], index: 1, kind: input, shape index: {}]   ;;  %s706_s2 = inlined_call_operand.vmem [shape: f32[1,128], index: 2, kind: input, shape index: {}]   ;;  %s707_s3 = inlined_call_operand.hbm [shape: f32[16,128], index: 3, kind: output, shape index: {}]  }
   0x1   :  { %10 = vsyncpa [#allocation3 + $0x1], 0 }
   0x2   :  { %11 = vsyncpa [#allocation6], 0 }
   0x3   :  { %12 = vsyncpa [#allocation4], 0 }
   0x4   :  { %14 = vsyncpa [#allocation4 + $0x1], 0  ;;  %s565_s12 = smov 0   ;;  %s567_s13 = smov 0  }
   0x5   :  { %s569_s14 = smov 0   ;;  %s571_s15 = smov 0  }
   0x6 LB: > { %s130_s18 = sshll.u32 %s705_s1, 4  ;;  %s589_s19 = sadd.s32 4294967295, %s540_s15   ;;  %s540_s15 = sphi %s571_s15, %s717_s15   ;;  %s536_s14 = sphi %s569_s14, %s716_s14   ;;  %s532_s13 = sphi %s567_s13, %s715_s13   ;;  %s528_s12 = sphi %s565_s12, %s714_s12   ;;  %s131_s18 = int_to_ptr.hbm [resolvable:$true] %s130_s18 }
   0x7   : > { %p336_p0 = scmp.ge.s32.totalorder %s540_s15, 1  ;;  %p41_p1 = scmp.eq.s32.totalorder %s589_s19, 0 }
   0x8   : > { %p119_p2 = scmp.lt.s32.totalorder %s540_s15, 3  ;;  %s542_s21 = smov [#allocation5]  }
   0x9   : > { %s132_s22 = sshll.u32 %s542_s21, 4  ;;  %s543_s23 = smov 128   ;;  %s133_s22 = int_to_ptr.vmem [resolvable:$true] %s132_s22 }
   0xa   : > { %p594_p3 = pnand %p336_p0, %p119_p2  ;;  %s544_s24 = smov 8  }
   0xb   : > { %s335_s25 = sadd.s32 4294967294, %s540_s15   ;;  %s605_s26 = sadd.s32 1, %s540_s15  }
   0xc   : > { %p358_p4 = pneg %p594_p3  ;;  %s27_s27 = sadd.s32 1, %s536_s14 }
   0xd   : > { %s24_s28 = ssub.s32 %s540_s15, %s605_s26  ;;  %p34_p7 = scmp.ne.s32.totalorder %s536_s14, %s532_s13 }
   0xe   : > { %p359_p6 = pnand %p358_p4, %p41_p1  ;;  %p25_p8 = scmp.eq.s32.totalorder %s24_s28, 0 }
   0xf   : > { %p35_p9 = scmp.eq.s32.totalorder %s540_s15, 0  ;;  %p40_p10 = scmp.ne.s32.totalorder %s532_s13, %s528_s12 }
  0x10   : > { %361 = dma.hbm_to_vmem [thread:$0]  (!%p359_p6), %s131_s18, 512, %s133_s22, [#allocation6], %s543_s23, %s543_s23, %s544_s24  }
  0x11   : > { %p106_p11 = scmp.eq.s32.totalorder %s589_s19, 1  ;;  %p621_p12 = por %p41_p1, %p40_p10 }
  0x12   : > { %s617_s29 = scalar_select %p25_p8, %s536_s14, %s27_s27  }
  0x13   : > { %p625_p13 = por %p106_p11, %p34_p7  ;;  %p112_p0 = scmp.eq.s32.totalorder %s335_s25, 1 }
  0x14   : > { %p36_p2 = por %p35_p9, %p34_p7  ;;  %s149_s5 = sand.u32 1, %s536_s14  }
  0x15   : > { %p630_p4 = por %p112_p0, %p40_p10  ;;  %p371_p6 = scmp.lt.s32.totalorder %s540_s15, 2 }
  0x16   : > { %s339_s7 = sshll.u32 %s149_s5, 3  ;;  %s340_s8 = sshll.u32 %s540_s15, 3 }
  0x17   : > { %s157_s11 = scalar_lea.hbm %s704_s0, %s340_s8  ;;  %s153_s17 = scalar_lea.vmem [#allocation2], %s339_s7 }
  0x18   : > { %s159_s16 = sshll.u32 %s157_s11, 4  ;;  %s161_s18 = sshll.u32 %s153_s17, 4  ;;  %s160_s16 = int_to_ptr.hbm [resolvable:$true] %s159_s16  ;;  %s162_s18 = int_to_ptr.vmem [resolvable:$true] %s161_s18 }
  0x19   : > { %p639_p8 = pnand %p371_p6, %p36_p2  ;;  %s150_s22 = scalar_lea.sflag [#allocation3], %s149_s5 }
  0x1a   : > { %s440_s23 = sshra.s32 %s160_s16, 4  ;;  %s447_s28 = scalar_lea.hbm %s704_s0, 16  ;;  %s441_s23 = int_to_ptr.hbm [resolvable:$true] %s440_s23 }
  0x1b   : > { %s442_s24 = scalar_lea.hbm %s441_s23, 8  ;;  %p444_p9 = pneg %p639_p8 }
  0x1c   : > { %p443_p7 = scmp.ne.s32.totalorder %s441_s23, %s442_s24  ;;  %p448_p0 = scmp.lt.s32.totalorder %s441_s23, %s704_s0 }
  0x1d   : > { %p449_p2 = scmp.lt.s32.totalorder %s447_s28, %s442_s24 }
  0x1e   : > { %p445_p10 = pnand %p444_p9, %p443_p7 }
  0x1f   : > { %p450_p6 = por %p449_p2, %p448_p0 }
  0x20   : > { %p446_p11 = pneg %p445_p10 }
  0x22   : > { %p451_p5 = pnand %p450_p6, %p446_p11 }
  0x24   : > { %454 = shalt.err (!%p451_p5)
}
  0x25   : > { %365 = dma.hbm_to_vmem [thread:$0]  (!%p639_p8), %s160_s16, 128, %s162_s18, %s150_s22  }
  0x26   : > { %170 = sbr.rel (%p594_p3) target bundleno = 185 (0xb9), region = 32  ;;  %s656_s5 = sand.u32 (!%p594_p3), 1, %s532_s13  }
  0x27   : > { %s342_s9 = sshll.u32 (!%p594_p3), %s656_s5, 3  ;;  %s173_s10 = scalar_lea.sflag (!%p594_p3), [#allocation3], %s656_s5 }
  0x28   : > { %s176_s11 = scalar_lea.vmem (!%p594_p3), [#allocation2], %s342_s9 }
  0x2b   : > { %515 = dma.done.wait (%p621_p12), %s173_s10, 128  }
  0x2c   : > { %517 = vsyncadd (%p621_p12), %s173_s10, 4294967168 }
  0x2d   : > { %519 = dma.done.wait (%p41_p1), [#allocation6], 512  }
  0x2e   : > { %521 = vsyncadd (%p41_p1), [#allocation6], 4294966784  ;;  %v209_v0 = vld [vmem:[#allocation5 + $0x18] sm:$0xff]  ;;  %v208_v1 = vld [vmem:[#allocation5 + $0x10] sm:$0xff]  ;;  %vm214_vm0 = vcmask 261120   ;;  %s347_s20 = sshll.u32 %s589_s19, 3 }
  0x2f   : > { %230 = vmatpush.msra.mxu0 %v209_v0  ;;  %v207_v2 = vld [vmem:[#allocation5 + $0x8] sm:$0xff]  ;;  %v206_v3 = vld [vmem:[#allocation5] sm:$0xff]  ;;  %v205_v4 = vld [vmem:[%s176_s11] sm:$0xff]  ;;  %s250_s17 = scalar_lea.hbm %s707_s3, %s347_s20  ;;  %s204_s22 = scalar_lea.vmem [#allocation7], %s342_s9 }
  0x30   : > { %v409_v5 = vld [vmem:[%s706_s2] ss:$0 sm:$0xff]  ;;  %s252_s23 = sshll.u32 %s204_s22, 4  ;;  %s254_s24 = sshll.u32 %s250_s17, 4  ;;  %s253_s23 = int_to_ptr.vmem [resolvable:$true] %s252_s23  ;;  %s255_s24 = int_to_ptr.hbm [resolvable:$true] %s254_s24 }
  0x31   : > { %231 = vmatpush.msra.mxu0 %v208_v1  ;;  %s240_s25 = scalar_lea.sflag [#allocation4], %s656_s5  ;;  %s484_s27 = sshra.s32 %s255_s24, 4  ;;  %s485_s27 = int_to_ptr.hbm [resolvable:$true] %s484_s27 }
  0x32   : > { %s486_s19 = scalar_lea.hbm %s485_s27, 8  ;;  %s490_s8 = scalar_lea.hbm %s707_s3, 16 }
  0x33   : > { %232 = vmatpush.msra.mxu0 %v207_v2  ;;  %p487_p1 = scmp.ne.s32.totalorder %s485_s27, %s486_s19  ;;  %p491_p12 = scmp.lt.s32.totalorder %s485_s27, %s707_s3 }
  0x34   : > { %p492_p8 = scmp.lt.s32.totalorder %s490_s8, %s486_s19 }
  0x35   : > { %233 = vmatpush.msra.mxu0 %v206_v3  ;;  %p488_p3 = pnand %p487_p1, %p625_p13 }
  0x36   : > { %345 = vmatmul.msk.f32.vlgmr.msra.gmra.mxu0 %vm214_vm0, %v205_v4  ;;  %p493_p7 = por %p492_p8, %p491_p12 }
  0x37   : > { %p489_p5 = pneg %p488_p3 }
  0x39   : > { %p494_p9 = pnand %p493_p7, %p489_p5 }
  0xb3   : > { %v235_v6 = vpop.f32.mrf.mxu0 }
  0xb4   : > { %v236_v7 = vadd.f32 %v409_v5, %v235_v6 }
  0xb6   : > { %238 = vst [vmem:[%s204_s22] sm:$0xff] %v236_v7 }
  0xb7   : > { %497 = shalt.err (!%p494_p9)
}
  0xb8   : > { %356 = dma.vmem_to_hbm [thread:$0]  (%p625_p13), %s253_s23, 128, %s255_s24, %s240_s25  }
  0xb9 PF: > { %s266_s5 = sand.u32 1, %s528_s12   ;;  %p713_p10 = scmp.ge.s32.totalorder %s540_s15, 2 }
  0xba   : > { %s267_s11 = scalar_lea.sflag [#allocation4], %s266_s5 }
  0xbb   : > { %p367_p11 = pnand %p713_p10, %p630_p4 }
  0xbd   : > { %p368_p0 = pneg %p367_p11 }
  0xbf   : > { %523 = dma.done.wait (%p368_p0), %s267_s11, 128  }
  0xc0   : > { %525 = vsyncadd (%p368_p0), %s267_s11, 4294967168  ;;  %p17_p2 = scmp.ge.s32.totalorder %s605_s26, 4   ;;  %s714_s12 = smov %s532_s13 }
  0xc1   : > { %s715_s13 = smov %s536_s14  ;;  %s716_s14 = smov %s617_s29 }
  0xc2   : > { %s717_s15 = smov %s605_s26  ;;  %19 = sbr.rel (!%p17_p2) target bundleno = 6 (0x6), region = 81 }
  0xc7   :  { %273 = vsyncpa [#allocation3], 1 }
  0xc8   :  { %275 = vsyncpa [#allocation3 + $0x1], 1 }
  0xc9   :  { %276 = vsyncpa [#allocation6], 1 }
  0xca   :  { %277 = vsyncpa [#allocation4], 1 }
  0xcb   :  { %279 = vsyncpa [#allocation4 + $0x1], 1 }

</bundles_post_ra>
